<compile_context>
chip_gen: v7x
topology: tpu7x:2x2x1
jax: 0.10.0
libtpu: 0.0.40
codegen_flags: <defaults>
</compile_context>

<pallas_src>
import functools

import jax
import jax.numpy as jnp
from jax.experimental import pallas as pl
from jax.experimental.pallas import tpu as pltpu

_BN_EPS = 1e-5
_NEG_SLOPE = 0.1
_VMEM_LIMIT = 48 * 1024 * 1024   # > v5e/v6e default scoped limits, < v7x physical 64 MiB


# ------------------------------ Pallas kernels ------------------------------ #
def _matmul_kernel(x_ref, w_ref, shift_ref, o_ref, *, apply_act):
    """out = [leaky_relu](x @ w + shift); bf16 operands, f32 accumulation/epilogue."""
    y = jnp.dot(x_ref[...], w_ref[...], preferred_element_type=jnp.float32)
    y = y + shift_ref[...]
    if apply_act:
        y = jnp.where(y >= 0, y, _NEG_SLOPE * y)
    o_ref[...] = y.astype(o_ref.dtype)


def _conv3x3_kernel(*refs, n_rows, wo, stride, apply_act, has_residual):
    """One output row (wo, tcout): accumulate 9 taps as small MXU dots, fused epilogue."""
    row_refs = refs[:n_rows]
    w_ref = refs[n_rows]
    shift_ref = refs[n_rows + 1]
    res_ref = refs[n_rows + 2] if has_residual else None
    o_ref = refs[-1]

    tcout = o_ref.shape[-1]
    acc = jnp.zeros((wo, tcout), jnp.float32)
    for kh in range(3):
        if stride == 1:
            taps = [(row_refs[kh], kw, kw) for kw in range(3)]
        else:
            # stride 2: even/odd column planes make every tap a *contiguous* slice.
            taps = [(row_refs[kh], 0, 0),        # even cols -> kw = 0
                    (row_refs[3 + kh], 0, 1),    # odd  cols -> kw = 1
                    (row_refs[kh], 1, 2)]        # even cols shifted -> kw = 2
        for ref, start, kw in taps:
            patch = ref[0, 0, start:start + wo, :]                  # (wo, Cin) bf16
            acc = acc + jnp.dot(patch, w_ref[kh, kw],
                                preferred_element_type=jnp.float32)
    y = acc + shift_ref[...]
    if apply_act:
        y = jnp.where(y >= 0, y, _NEG_SLOPE * y)
    if has_residual:
        y = y + res_ref[0, 0].astype(jnp.float32)
    o_ref[0, 0] = y.astype(o_ref.dtype)


# ------------------------------ conv wrappers ------------------------------- #
def conv1x1(x, w, shift, *, apply_act):
    """1x1 conv on NHWC x as a row-tiled bf16 matmul with fused bias/BN-shift + LeakyReLU."""
    n, h, wd, cin = x.shape
    cout = w.shape[-1]
    m = n * h * wd
    xm = x.reshape(m, cin)
    tm = m if m <= 256 else 256          # big tiles amortize per-grid-step overhead
    grid = (pl.cdiv(m, tm),)             # ragged tail -> Pallas boundary-block padding;
                                         # each output row depends only on its own input row.
    kernel = functools.partial(_matmul_kernel, apply_act=apply_act)
    out = pl.pallas_call(
        kernel,
        out_shape=jax.ShapeDtypeStruct((m, cout), jnp.bfloat16),
        grid_spec=pltpu.PrefetchScalarGridSpec(
            num_scalar_prefetch=0,
            grid=grid,
            in_specs=[
                pl.BlockSpec((tm, cin), lambda i: (i, 0)),       # bf16 activations
                pl.BlockSpec((cin, cout), lambda i: (0, 0)),     # resident bf16 weights
                pl.BlockSpec((1, cout), lambda i: (0, 0)),       # f32 folded shift
            ],
            out_specs=pl.BlockSpec((tm, cout), lambda i: (i, 0)),
        ),
        compiler_params=pltpu.CompilerParams(
            dimension_semantics=("parallel",),                   # v7x: shard tiles on 2 TCs
            vmem_limit_bytes=_VMEM_LIMIT),
    )(xm, w, shift.reshape(1, cout).astype(jnp.float32))
    return out.reshape(n, h, wd, cout)


def conv3x3(x, w, shift, *, stride, apply_act, residual=None):
    """3x3 conv (padding=1, stride 1 or 2) on NHWC x; 9 taps accumulated in-kernel."""
    n, h, wd, cin = x.shape
    cout = w.shape[-1]
    ho = (h - 1) // stride + 1
    wo = (wd - 1) // stride + 1
    xp = jnp.pad(x, ((0, 0), (1, 1), (1, 1), (0, 0)))            # 1x copy, not 9x im2col

    # Cout tiling: keeps the resident weight block small and output lanes >= 128.
    tcout = 256 if (cout > 256 and cout % 256 == 0) else cout
    grid = (cout // tcout, n, ho)        # weight tile (depends on j only) changes least often

    if stride == 1:
        row_args = [xp, xp, xp]
        widths = [wd + 2] * 3
        row_maps = [(lambda j, b, i, kh=kh: (b, i + kh, 0, 0)) for kh in range(3)]
    else:
        xe = xp[:, :, 0::2, :]           # even padded columns
        xo = xp[:, :, 1::2, :]           # odd  padded columns
        row_args = [xe, xe, xe, xo, xo, xo]
        widths = [xe.shape[2]] * 3 + [xo.shape[2]] * 3
        row_maps = [(lambda j, b, i, kh=kh: (b, 2 * i + kh, 0, 0)) for kh in range(3)] * 2

    n_rows = len(row_args)
    in_specs = [pl.BlockSpec((1, 1, widths[r], cin), row_maps[r]) for r in range(n_rows)]
    in_specs += [
        pl.BlockSpec((3, 3, cin, tcout), lambda j, b, i: (0, 0, 0, j)),   # bf16 weights
        pl.BlockSpec((1, tcout), lambda j, b, i: (0, j)),                 # f32 folded shift
    ]
    args = row_args + [w, shift.reshape(1, cout).astype(jnp.float32)]

    has_residual = residual is not None
    if has_residual:
        in_specs.append(pl.BlockSpec((1, 1, wo, tcout), lambda j, b, i: (b, i, 0, j)))
        args.append(residual)

    kernel = functools.partial(_conv3x3_kernel, n_rows=n_rows, wo=wo, stride=stride,
                               apply_act=apply_act, has_residual=has_residual)
    return pl.pallas_call(
        kernel,
        out_shape=jax.ShapeDtypeStruct((n, ho, wo, cout), jnp.bfloat16),
        grid_spec=pltpu.PrefetchScalarGridSpec(
            num_scalar_prefetch=0,
            grid=grid,
            in_specs=in_specs,
            out_specs=pl.BlockSpec((1, 1, wo, tcout), lambda j, b, i: (b, i, 0, j)),
        ),
        compiler_params=pltpu.CompilerParams(
            dimension_semantics=("parallel", "parallel", "parallel"),
            vmem_limit_bytes=_VMEM_LIMIT),
    )(*args)


# ------------------------------- model glue --------------------------------- #
def _fold_bn(w, bias, gamma, beta, mean, var):
    """Fold inference BN into the conv: w' = w*scale (per out-ch), shift = (b-mean)*scale+beta."""
    s = gamma / jnp.sqrt(var + _BN_EPS)
    return (w * s).astype(jnp.bfloat16), (bias - mean) * s + beta


# TODO(synk): BatchNorm uses running-stats (inference) folding; PyTorch training-mode
#             batch statistics are not computed in-kernel.
def init_params(key, num_classes=80, blocks=(1, 3, 8, 8, 5), heads=(3, 3, 3)):
    state = {'key': key}

    def take():
        state['key'], sub = jax.random.split(state['key'])
        return sub

    def conv_w(shape):
        fan_in = 1
        for d in shape[:-1]:
            fan_in *= d
        return jax.random.normal(take(), shape, jnp.float32) / jnp.sqrt(float(fan_in))

    def bias(c):
        return 0.1 * jax.random.normal(take(), (c,), jnp.float32)

    def bn(c):
        gamma = 0.5 + jax.random.uniform(take(), (c,), jnp.float32)
        beta = 0.1 * jax.random.normal(take(), (c,), jnp.float32)
        mean = 0.1 * jax.random.normal(take(), (c,), jnp.float32)
        var = 0.5 + jax.random.uniform(take(), (c,), jnp.float32)
        return gamma, beta, mean, var

    def conv_bn(shape):                       # conv + BN folded, bf16 weight / f32 shift
        c = shape[-1]
        return _fold_bn(conv_w(shape), bias(c), *bn(c))

    def plain_conv(shape):                    # conv + bias only (no BN)
        return conv_w(shape).astype(jnp.bfloat16), bias(shape[-1])

    def make_block(c_in, c_mid):              # basic_block: 1x1 c_in->c_mid, 3x3 c_mid->2*c_mid
        w1, t1 = conv_bn((c_in, c_mid))
        w2, t2 = conv_bn((3, 3, c_mid, 2 * c_mid))
        return {'w1': w1, 't1': t1, 'w2': w2, 't2': t2}

    base_filters = (64, 128, 256, 512, 1024)
    head_filters = (1024, 512, 256)
    head_pre = (256, 128)
    head_ins = (1024, 512 + 256, 256 + 128)
    num_attrs = (num_classes + 1 + 4) * 3

    conv1_w, conv1_b = plain_conv((3, 32))
    stages = []
    for c, nblk in zip(base_filters, blocks):
        dw, db = plain_conv((3, 3, c // 2, c))
        # NOTE: `*[basic_block(c, c//2)] * n` in PyTorch repeats the SAME module instance
        # n times -> one parameter set per stage, applied n times.
        stages.append({'down_w': dw, 'down_b': db, 'n': nblk, 'block': make_block(c, c // 2)})

    pre_heads = []
    for inc, prec in zip(head_filters[:-1], head_pre):
        w, t = conv_bn((inc, prec))
        pre_heads.append({'w': w, 't': t})

    heads_p = []
    for cin, cf, nh in zip(head_ins, head_filters, heads):
        hp = {'n': nh, 'first': make_block(cin, cf // 2)}
        hp['rest'] = make_block(cf, cf // 2) if nh > 1 else None   # same instance reused
        heads_p.append(hp)

    encode = [plain_conv((cf, num_attrs)) for cf in head_filters]
    return {'conv1': (conv1_w, conv1_b), 'stages': stages, 'pre_heads': pre_heads,
            'heads': heads_p, 'encode': encode}


def basic_block_fwd(x, p, shotcut=True):
    """x -> 1x1+BN+LeakyReLU -> 3x3+BN+LeakyReLU (+x if shotcut), all fused in-kernel."""
    # TODO(synk): the 1x1 and 3x3 convs are two pallas_calls; the half-channel intermediate
    #             still round-trips HBM once (fusing them would need a rolling-row scratch).
    h = conv1x1(x, p['w1'], p['t1'], apply_act=True)
    return conv3x3(h, p['w2'], p['t2'], stride=1, apply_act=True,
                   residual=x if shotcut else None)


def yolov3_forward(x_nchw, params):
    x = jnp.transpose(x_nchw, (0, 2, 3, 1)).astype(jnp.bfloat16)   # NCHW -> NHWC, bf16 acts
    # DarkNet backbone.
    w1, b1 = params['conv1']
    x = conv1x1(x, w1, b1, apply_act=True)                         # conv1: no BN, LeakyReLU
    feats = []
    for st in params['stages']:
        x = conv3x3(x, st['down_w'], st['down_b'], stride=2, apply_act=False)  # plain conv
        for _ in range(st['n']):                                   # same block params n times
            x = basic_block_fwd(x, st['block'], shotcut=True)
        feats.append(x)
    # Detection heads.
    *feas, out = feats
    codes = []
    for i, hp in enumerate(params['heads']):
        if i > 0:
            ph = params['pre_heads'][i - 1]
            out = conv1x1(out, ph['w'], ph['t'], apply_act=True)
            # TODO(synk): nearest 2x upsample + channel concat stay as XLA layout glue.
            out = jnp.repeat(jnp.repeat(out, 2, axis=1), 2, axis=2)
            out = jnp.concatenate([out, feas[-i]], axis=-1)
        out = basic_block_fwd(out, hp['first'], shotcut=False)
        for _ in range(hp['n'] - 1):                               # same trailing instance
            out = basic_block_fwd(out, hp['rest'], shotcut=False)
        ew, eb = params['encode'][i]
        code = conv1x1(out, ew, eb, apply_act=False)
        codes.append(code)
    return [jnp.transpose(c, (0, 3, 1, 2)).astype(jnp.float32) for c in codes]


if __name__ == "__main__":
    key = jax.random.PRNGKey(0)
    kp, kx = jax.random.split(key)
    # Yolov3 hard-codes 5 darknet stages (64..1024 channels), so spatial must be >= 32;
    # keep block/head repetition counts at 1 to stay small.
    params = init_params(kp, num_classes=80, blocks=(1, 1, 1, 1, 1), heads=(1, 1, 1))
    x = jax.random.normal(kx, (2, 3, 32, 32), jnp.float32)
    codes = jax.block_until_ready(yolov3_forward(x, params))
    assert codes[0].shape == (2, 255, 1, 1)
    assert codes[1].shape == (2, 255, 2, 2)
    assert codes[2].shape == (2, 255, 4, 4)
    assert all(bool(jnp.isfinite(c).all()) for c in codes)
    print("KERNEL_OK")
</pallas_src>

<mosaic_0001>
module attributes {stable_mosaic.version = 11 : i64} {
  func.func @_matmul_kernel(%arg0: i32, %arg1: memref<256x3xbf16, #tpu.memory_space<vmem>>, %arg2: memref<3x32xbf16, #tpu.memory_space<vmem>>, %arg3: memref<1x32xf32, #tpu.memory_space<vmem>>, %arg4: memref<256x32xbf16, #tpu.memory_space<vmem>>) attributes {dimension_semantics = [#tpu.dimension_semantics<parallel>], iteration_bounds = array<i64: 8>, scalar_prefetch = 0 : i64, scratch_operands = 0 : i64, tpu.core_type = #tpu.core_type<tc>, window_params = [{transform_indices = @transform_0, window_bounds = array<i64: 256, 3>}, {pipeline_mode = #tpu.pipeline_mode<synchronous>, transform_indices = @transform_1, window_bounds = array<i64: 3, 32>}, {pipeline_mode = #tpu.pipeline_mode<synchronous>, transform_indices = @transform_2, window_bounds = array<i64: 1, 32>}, {transform_indices = @transform_3, window_bounds = array<i64: 256, 32>}]} {
    %c0 = arith.constant 0 : index
    %c0_0 = arith.constant 0 : index
    %0 = vector.load %arg1[%c0, %c0_0] : memref<256x3xbf16, #tpu.memory_space<vmem>>, vector<256x3xbf16>
    %c0_1 = arith.constant 0 : index
    %c0_2 = arith.constant 0 : index
    %1 = vector.load %arg2[%c0_1, %c0_2] : memref<3x32xbf16, #tpu.memory_space<vmem>>, vector<3x32xbf16>
    %cst = arith.constant dense<0.000000e+00> : vector<256x32xf32>
    %2 = tpu.matmul %0, %1, %cst {dimension_numbers = #tpu.dot_dimension_numbers<[1], [0], [0], [1], [0, 0, 1, 1], [], []>} : vector<256x3xbf16>, vector<3x32xbf16>, vector<256x32xf32> -> vector<256x32xf32>
    %c0_3 = arith.constant 0 : index
    %c0_4 = arith.constant 0 : index
    %3 = vector.load %arg3[%c0_3, %c0_4] : memref<1x32xf32, #tpu.memory_space<vmem>>, vector<1x32xf32>
    %4 = vector.broadcast %3 : vector<1x32xf32> to vector<256x32xf32>
    %5 = arith.addf %2, %4 : vector<256x32xf32>
    %cst_5 = arith.constant 0.000000e+00 : f32
    %6 = vector.broadcast %cst_5 : f32 to vector<256x32xf32>
    %7 = arith.cmpf oge, %5, %6 : vector<256x32xf32>
    %cst_6 = arith.constant 1.000000e-01 : f32
    %8 = vector.broadcast %cst_6 : f32 to vector<256x32xf32>
    %9 = arith.mulf %8, %5 : vector<256x32xf32>
    %10 = arith.select %7, %5, %9 : vector<256x32xi1>, vector<256x32xf32>
    %11 = arith.truncf %10 : vector<256x32xf32> to vector<256x32xbf16>
    %c0_7 = arith.constant 0 : index
    %c0_8 = arith.constant 0 : index
    %12 = vector.load %arg4[%c0_7, %c0_8] : memref<256x32xbf16, #tpu.memory_space<vmem>>, vector<256x32xbf16>
    tpu.vector_store %arg4[%c0_7, %c0_8], %11 {strides = array<i32>} : memref<256x32xbf16, #tpu.memory_space<vmem>>, vector<256x32xbf16>,
    return
  }
  func.func @transform_0(%arg0: i32) -> (i32, i32) {
    %c0_i32 = arith.constant 0 : i32
    %c0_i32_0 = arith.constant 0 : i32
    return %arg0, %c0_i32 : i32, i32
  }
  func.func @transform_1(%arg0: i32) -> (i32, i32) {
    %c0_i32 = arith.constant 0 : i32
    %c0_i32_0 = arith.constant 0 : i32
    %c0_i32_1 = arith.constant 0 : i32
    return %c0_i32, %c0_i32_0 : i32, i32
  }
  func.func @transform_2(%arg0: i32) -> (i32, i32) {
    %c0_i32 = arith.constant 0 : i32
    %c0_i32_0 = arith.constant 0 : i32
    %c0_i32_1 = arith.constant 0 : i32
    return %c0_i32, %c0_i32_0 : i32, i32
  }
  func.func @transform_3(%arg0: i32) -> (i32, i32) {
    %c0_i32 = arith.constant 0 : i32
    %c0_i32_0 = arith.constant 0 : i32
    return %arg0, %c0_i32 : i32, i32
  }
}

</mosaic_0001>

<bundles_post_ra>
// kernel: tpu_custom_call.1
= control target key start
LH: loop header
LB: loop body
LE: loop exit
PB: predicated region body
PF: predicated region fallthrough
CT: control target
= control target key end

     0   :  { %s1040_s12 = smov 0   ;;  %s1206_s0 = inlined_call_operand.vmem [shape: bf16[2048,3], index: 0, kind: input, shape index: {}]   ;;  %s1207_s1 = inlined_call_operand.vmem [shape: bf16[3,32], index: 1, kind: input, shape index: {}]   ;;  %s1208_s2 = inlined_call_operand.vmem [shape: f32[1,32], index: 2, kind: input, shape index: {}]   ;;  %s1209_s3 = inlined_call_operand.vmem [shape: bf16[2048,32], index: 3, kind: output, shape index: {}]  }
   0x1 LB: > { %s825_s13 = sadd.s32 4294967295, %s1017_s12   ;;  %p829_p0 = scmp.ge.s32.totalorder %s1017_s12, 1  ;;  %s1017_s12 = sphi %s1040_s12, %s13_s12  }
   0x2   : > { %p138_p1 = scmp.lt.s32.totalorder %s1017_s12, 9 }
   0x4   : > { %p139_p2 = pnand %p829_p0, %p138_p1 }
   0x5   : > { %v207_v0 = vld [vmem:[%s1207_s1] sm:$0x3] (!%p139_p2)  ;;  %vm344_vm0 = vcmask (!%p139_p2), 1040384   ;;  %vm345_vm1 = vcmask (!%p139_p2), 1041408   ;;  %s830_s16 = sshll.u32 (!%p139_p2), %s825_s13, 5  ;;  %v1019_v1 = vmov (!%p139_p2), 65535  }
   0x6   : > { %142 = sbr.rel (%p139_p2) target bundleno = 276 (0x114), region = 32  ;;  %v346_v2 = vsel (!%p139_p2), %vm344_vm0, 4294967295, %v1019_v1  ;;  %p163_p3 = scmp.lt.s32.totalorder (!%p139_p2), %s830_s16, 255  ;;  %vm295_vm2 = vcmask (!%p139_p2), 23552   ;;  %v1096_v21 = vld [vmem:[%s1208_s2] ss:$0 sm:$0xff] (!%p139_p2) }
   0x7   : > { %v347_v3 = vsel (!%p139_p2), %vm345_vm1, %v346_v2, 0  ;;  %vm736_vm3 = vcmask (!%p139_p2), 257024  }
   0x8   : > { %v349_v4 = vand.u32 (!%p139_p2), %v347_v3, %v207_v0 }
   0xa   : > { %950 = vmatprep.subr.bf16.mxu0 (!%p139_p2), %v349_v4  ;;  %984 = vmatprep.subr.bf16.mxu1 (!%p139_p2), %v349_v4 }
   0xb   : > { %951 = vmatpush3.bf16.msra.mxu0 (!%p139_p2), %v349_v4  ;;  %985 = vmatpush3.bf16.msra.mxu1 (!%p139_p2), %v349_v4 }
   0xd   : > { %s1211_s16 = smov (!%p163_p3, %s830_s16), 255 }
   0xe   : > { %s831_s17 = sshll.u32 %s1211_s16, 2 }
   0xf   : > { %s1059_s20 = scalar_lea.vmem %s1206_s0, %s831_s17  ;;  %s1108_s25 = scalar_lea.vmem %s1209_s3, %s831_s17 }
  0x10   : > { %v995_v5 = vld [vmem:[%s1059_s20] sm:$0xff]   ;;  %v997_v7 = vld [vmem:[%s1059_s20 + $0x8] sm:$0xff]   ;;  %v999_v9 = vld [vmem:[%s1059_s20 + $0x10] sm:$0xff]  }
  0x11   : > { %v996_v6 = vld [vmem:[%s1059_s20 + $0x40] sm:$0xff]   ;;  %952 = vmatprep.mubr.msk.bf16.mxu0 %vm295_vm2, %v995_v5  ;;  %v998_v8 = vld [vmem:[%s1059_s20 + $0x48] sm:$0xff]   ;;  %v1000_v10 = vld [vmem:[%s1059_s20 + $0x50] sm:$0xff]  }
  0x12   : > { %968 = vmatprep.mubr.msk.bf16.mxu1 %vm295_vm2, %v996_v6  ;;  %953 = vmatmul.mubr.msk.bf16.vlgmr.msra.gmra.mrb[0].mxu0 %vm295_vm2, %v997_v7  ;;  %v1001_v11 = vld [vmem:[%s1059_s20 + $0x18] sm:$0xff]   ;;  %v1003_v13 = vld [vmem:[%s1059_s20 + $0x20] sm:$0xff]   ;;  %v1005_v15 = vld [vmem:[%s1059_s20 + $0x28] sm:$0xff]  }
  0x13   : > { %969 = vmatmul.mubr.msk.bf16.vlgmr.msra.gmra.mrb[0].mxu1 %vm295_vm2, %v998_v8  ;;  %956 = vmatprep.mubr.msk.bf16.mxu0 %vm295_vm2, %v999_v9  ;;  %v1002_v12 = vld [vmem:[%s1059_s20 + $0x58] sm:$0xff]   ;;  %v1004_v14 = vld [vmem:[%s1059_s20 + $0x60] sm:$0xff]   ;;  %v1006_v16 = vld [vmem:[%s1059_s20 + $0x68] sm:$0xff]  }
  0x14   : > { %972 = vmatprep.mubr.msk.bf16.mxu1 %vm295_vm2, %v1000_v10  ;;  %v1007_v17 = vld [vmem:[%s1059_s20 + $0x30] sm:$0xff]   ;;  %v1009_v19 = vld [vmem:[%s1059_s20 + $0x38] sm:$0xff]  }
  0x15   : > { %v1008_v18 = vld [vmem:[%s1059_s20 + $0x70] sm:$0xff]   ;;  %v1010_v20 = vld [vmem:[%s1059_s20 + $0x78] sm:$0xff]  }
  0x1a   : > { %957 = vmatmul.mubr.msk.bf16.gmra.mrb[4].mxu0 %vm295_vm2, %v1001_v11 }
  0x1b   : > { %973 = vmatmul.mubr.msk.bf16.gmra.mrb[4].mxu1 %vm295_vm2, %v1002_v12  ;;  %960 = vmatprep.mubr.msk.bf16.mxu0 %vm295_vm2, %v1003_v13 }
  0x1c   : > { %976 = vmatprep.mubr.msk.bf16.mxu1 %vm295_vm2, %v1004_v14 }
  0x22   : > { %961 = vmatmul.mubr.msk.bf16.gmra.mrb[8].mxu0 %vm295_vm2, %v1005_v15 }
  0x23   : > { %977 = vmatmul.mubr.msk.bf16.gmra.mrb[8].mxu1 %vm295_vm2, %v1006_v16  ;;  %964 = vmatprep.mubr.msk.bf16.mxu0 %vm295_vm2, %v1007_v17 }
  0x24   : > { %980 = vmatprep.mubr.msk.bf16.mxu1 %vm295_vm2, %v1008_v18 }
  0x2a   : > { %965 = vmatmul.mubr.msk.bf16.gmra.mrb[12].mxu0 %vm295_vm2, %v1009_v19 }
  0x2b   : > { %981 = vmatmul.mubr.msk.bf16.gmra.mrb[12].mxu1 %vm295_vm2, %v1010_v20 }
  0xe5   : > { %v954_v22 = vpop.f32.mrb[0].mxu0 }
  0xe6   : > { %v394_v23 = vadd.f32 %v954_v22, %v1096_v21  ;;  %v970_v24 = vpop.f32.mrb[0].mxu1  ;;  %v385_v25 = vpop.f32.mrb[1].mxu0 }
  0xe7   : > { %v458_v26 = vadd.f32 %v970_v24, %v1096_v21  ;;  %v386_v27 = vadd.f32 %v1096_v21, %v385_v25  ;;  %v449_v28 = vpop.f32.mrb[1].mxu1  ;;  %v955_v29 = vpop.f32.mrb[2].mxu0 }
  0xe8   : > { %vm514_vm4 = vcmp.ge.f32.partialorder %v394_v23, 0.0  ;;  %v546_v30 = vmul.f32 0.1, %v394_v23  ;;  %v450_v31 = vadd.f32 %v1096_v21, %v449_v28  ;;  %v397_v32 = vadd.f32 %v955_v29, %v1096_v21  ;;  %v971_v33 = vpop.f32.mrb[2].mxu1  ;;  %v388_v34 = vpop.f32.mrb[3].mxu0 }
  0xe9   : > { %vm530_vm5 = vcmp.ge.f32.partialorder %v458_v26, 0.0  ;;  %v562_v35 = vmul.f32 0.1, %v458_v26  ;;  %vm512_vm6 = vcmp.ge.f32.partialorder %v386_v27, 0.0  ;;  %v544_v36 = vmul.f32 0.1, %v386_v27 }
  0xea   : > { %v578_v37 = vsel %vm514_vm4, %v394_v23, %v546_v30  ;;  %vm528_vm7 = vcmp.ge.f32.partialorder %v450_v31, 0.0  ;;  %v560_v38 = vmul.f32 0.1, %v450_v31  ;;  %vm515_vm8 = vcmp.ge.f32.partialorder %v397_v32, 0.0  ;;  %v452_v39 = vpop.f32.mrb[3].mxu1 }
  0xeb   : > { %v903_v40 = vpack.c.bf16 %v578_v37, %v578_v37  ;;  %v594_v41 = vsel %vm530_vm5, %v458_v26, %v562_v35  ;;  %v576_v42 = vsel %vm512_vm6, %v386_v27, %v544_v36  ;;  %v547_v43 = vmul.f32 0.1, %v397_v32 }
  0xec   : > { %v919_v44 = vpack.c.bf16 %v594_v41, %v594_v41  ;;  %v901_v45 = vpack.c.bf16 %v576_v42, %v576_v42  ;;  %v592_v46 = vsel %vm528_vm7, %v450_v31, %v560_v38  ;;  %v461_v47 = vadd.f32 %v971_v33, %v1096_v21 }
  0xed   : > { %739 = vst.msk [vmem:[%s1108_s25 + $0x8] sm:$0xf] %vm736_vm3, %v903_v40  ;;  %v917_v48 = vpack.c.bf16 %v592_v46, %v592_v46  ;;  %v579_v49 = vsel %vm515_vm8, %v397_v32, %v547_v43  ;;  %v389_v50 = vadd.f32 %v1096_v21, %v388_v34  ;;  %v453_v51 = vadd.f32 %v1096_v21, %v452_v39  ;;  %v958_v52 = vpop.f32.mrb[4].mxu0 }
  0xee   : > { %755 = vst.msk [vmem:[%s1108_s25 + $0x48] sm:$0xf] %vm736_vm3, %v919_v44  ;;  %737 = vst.msk [vmem:[%s1108_s25] sm:$0xf] %vm736_vm3, %v901_v45  ;;  %v904_v53 = vpack.c.bf16 %v579_v49, %v579_v49  ;;  %vm531_vm9 = vcmp.ge.f32.partialorder %v461_v47, 0.0  ;;  %v410_v55 = vadd.f32 %v958_v52, %v1096_v21  ;;  %v974_v56 = vpop.f32.mrb[4].mxu1 }
  0xef   : > { %v563_v54 = vmul.f32 0.1, %v461_v47  ;;  %v401_v57 = vpop.f32.mrb[5].mxu0  ;;  %753 = vst.msk [vmem:[%s1108_s25 + $0x40] sm:$0xf] %vm736_vm3, %v917_v48  ;;  %vm513_vm10 = vcmp.ge.f32.partialorder %v389_v50, 0.0  ;;  %v474_v62 = vadd.f32 %v974_v56, %v1096_v21 }
  0xf0   : > { %v545_v58 = vmul.f32 0.1, %v389_v50  ;;  %vm529_vm11 = vcmp.ge.f32.partialorder %v453_v51, 0.0  ;;  %v561_v59 = vmul.f32 0.1, %v453_v51  ;;  %vm518_vm12 = vcmp.ge.f32.partialorder %v410_v55, 0.0 }
  0xf1   : > { %740 = vst.msk [vmem:[%s1108_s25 + $0xc] sm:$0xf] %vm736_vm3, %v904_v53  ;;  %v595_v60 = vsel %vm531_vm9, %v461_v47, %v563_v54  ;;  %v550_v61 = vmul.f32 0.1, %v410_v55  ;;  %v465_v63 = vpop.f32.mrb[5].mxu1  ;;  %v959_v0 = vpop.f32.mrb[6].mxu0  ;;  %v402_v4 = vadd.f32 %v1096_v21, %v401_v57 }
  0xf2   : > { %v920_v1 = vpack.c.bf16 %v595_v60, %v595_v60  ;;  %v577_v2 = vsel %vm513_vm10, %v389_v50, %v545_v58  ;;  %v593_v3 = vsel %vm529_vm11, %v453_v51, %v561_v59  ;;  %v975_v5 = vpop.f32.mrb[6].mxu1  ;;  %v404_v6 = vpop.f32.mrb[7].mxu0  ;;  %vm534_vm13 = vcmp.ge.f32.partialorder %v474_v62, 0.0 }
  0xf3   : > { %v902_v7 = vpack.c.bf16 %v577_v2, %v577_v2  ;;  %v918_v8 = vpack.c.bf16 %v593_v3, %v593_v3  ;;  %v582_v9 = vsel %vm518_vm12, %v410_v55, %v550_v61  ;;  %v468_v10 = vpop.f32.mrb[7].mxu1  ;;  %v566_v12 = vmul.f32 0.1, %v474_v62 }
  0xf4   : > { %756 = vst.msk [vmem:[%s1108_s25 + $0x4c] sm:$0xf] %vm736_vm3, %v920_v1  ;;  %v907_v11 = vpack.c.bf16 %v582_v9, %v582_v9  ;;  %vm516_vm14 = vcmp.ge.f32.partialorder %v402_v4, 0.0  ;;  %v548_v13 = vmul.f32 0.1, %v402_v4  ;;  %v466_v14 = vadd.f32 %v1096_v21, %v465_v63 }
  0xf5   : > { %738 = vst.msk [vmem:[%s1108_s25 + $0x4] sm:$0xf] %vm736_vm3, %v902_v7  ;;  %754 = vst.msk [vmem:[%s1108_s25 + $0x44] sm:$0xf] %vm736_vm3, %v918_v8  ;;  %v413_v15 = vadd.f32 %v959_v0, %v1096_v21  ;;  %v477_v16 = vadd.f32 %v975_v5, %v1096_v21  ;;  %v405_v17 = vadd.f32 %v1096_v21, %v404_v6  ;;  %v962_v22 = vpop.f32.mrb[8].mxu0 }
  0xf6   : > { %743 = vst.msk [vmem:[%s1108_s25 + $0x18] sm:$0xf] %vm736_vm3, %v907_v11  ;;  %v598_v18 = vsel %vm534_vm13, %v474_v62, %v566_v12  ;;  %v580_v19 = vsel %vm516_vm14, %v402_v4, %v548_v13  ;;  %v469_v20 = vadd.f32 %v1096_v21, %v468_v10  ;;  %vm532_vm15 = vcmp.ge.f32.partialorder %v466_v14, 0.0  ;;  %v978_v26 = vpop.f32.mrb[8].mxu1  ;;  %v417_v27 = vpop.f32.mrb[9].mxu0 }
  0xf7   : > { %v923_v23 = vpack.c.bf16 %v598_v18, %v598_v18  ;;  %v905_v24 = vpack.c.bf16 %v580_v19, %v580_v19  ;;  %v564_v25 = vmul.f32 0.1, %v466_v14  ;;  %vm519_vm0 = vcmp.ge.f32.partialorder %v413_v15, 0.0  ;;  %v481_v32 = vpop.f32.mrb[9].mxu1  ;;  %v963_v33 = vpop.f32.mrb[10].mxu0 }
  0xf8   : > { %v551_v28 = vmul.f32 0.1, %v413_v15  ;;  %vm535_vm1 = vcmp.ge.f32.partialorder %v477_v16, 0.0  ;;  %v567_v29 = vmul.f32 0.1, %v477_v16  ;;  %vm517_vm2 = vcmp.ge.f32.partialorder %v405_v17, 0.0 }
  0xf9   : > { %759 = vst.msk [vmem:[%s1108_s25 + $0x58] sm:$0xf] %vm736_vm3, %v923_v23  ;;  %741 = vst.msk [vmem:[%s1108_s25 + $0x10] sm:$0xf] %vm736_vm3, %v905_v24  ;;  %v596_v30 = vsel %vm532_vm15, %v466_v14, %v564_v25  ;;  %v549_v31 = vmul.f32 0.1, %v405_v17  ;;  %v426_v43 = vadd.f32 %v962_v22, %v1096_v21  ;;  %v490_v47 = vadd.f32 %v978_v26, %v1096_v21 }
  0xfa   : > { %vm533_vm4 = vcmp.ge.f32.partialorder %v469_v20, 0.0  ;;  %v921_v34 = vpack.c.bf16 %v596_v30, %v596_v30  ;;  %v583_v35 = vsel %vm519_vm0, %v413_v15, %v551_v28  ;;  %v599_v36 = vsel %vm535_vm1, %v477_v16, %v567_v29  ;;  %v979_v38 = vpop.f32.mrb[10].mxu1  ;;  %v420_v39 = vpop.f32.mrb[11].mxu0 }
  0xfb   : > { %v565_v37 = vmul.f32 0.1, %v469_v20  ;;  %v908_v40 = vpack.c.bf16 %v583_v35, %v583_v35  ;;  %v924_v41 = vpack.c.bf16 %v599_v36, %v599_v36  ;;  %v581_v42 = vsel %vm517_vm2, %v405_v17, %v549_v31  ;;  %v484_v44 = vpop.f32.mrb[11].mxu1 }
  0xfc   : > { %757 = vst.msk [vmem:[%s1108_s25 + $0x50] sm:$0xf] %vm736_vm3, %v921_v34  ;;  %v906_v45 = vpack.c.bf16 %v581_v42, %v581_v42  ;;  %v418_v48 = vadd.f32 %v1096_v21, %v417_v27  ;;  %vm522_vm5 = vcmp.ge.f32.partialorder %v426_v43, 0.0  ;;  %v554_v50 = vmul.f32 0.1, %v426_v43 }
  0xfd   : > { %v597_v46 = vsel %vm533_vm4, %v469_v20, %v565_v37  ;;  %744 = vst.msk [vmem:[%s1108_s25 + $0x1c] sm:$0xf] %vm736_vm3, %v908_v40  ;;  %760 = vst.msk [vmem:[%s1108_s25 + $0x5c] sm:$0xf] %vm736_vm3, %v924_v41  ;;  %v482_v51 = vadd.f32 %v1096_v21, %v481_v32  ;;  %vm538_vm6 = vcmp.ge.f32.partialorder %v490_v47, 0.0  ;;  %v429_v56 = vadd.f32 %v963_v33, %v1096_v21  ;;  %v966_v57 = vpop.f32.mrb[12].mxu0 }
  0xfe   : > { %v922_v49 = vpack.c.bf16 %v597_v46, %v597_v46  ;;  %742 = vst.msk [vmem:[%s1108_s25 + $0x14] sm:$0xf] %vm736_vm3, %v906_v45  ;;  %v570_v52 = vmul.f32 0.1, %v490_v47  ;;  %vm520_vm7 = vcmp.ge.f32.partialorder %v418_v48, 0.0  ;;  %v586_v54 = vsel %vm522_vm5, %v426_v43, %v554_v50  ;;  %v982_v58 = vpop.f32.mrb[12].mxu1 }
  0xff   : > { %v552_v53 = vmul.f32 0.1, %v418_v48  ;;  %vm536_vm8 = vcmp.ge.f32.partialorder %v482_v51, 0.0  ;;  %v568_v55 = vmul.f32 0.1, %v482_v51  ;;  %v911_v59 = vpack.c.bf16 %v586_v54, %v586_v54  ;;  %v433_v63 = vpop.f32.mrb[13].mxu0 }
 0x100   : > { %758 = vst.msk [vmem:[%s1108_s25 + $0x54] sm:$0xf] %vm736_vm3, %v922_v49  ;;  %v602_v60 = vsel %vm538_vm6, %v490_v47, %v570_v52  ;;  %v493_v62 = vadd.f32 %v979_v38, %v1096_v21  ;;  %v497_v0 = vpop.f32.mrb[13].mxu1  ;;  %vm523_vm9 = vcmp.ge.f32.partialorder %v429_v56, 0.0  ;;  %v967_v4 = vpop.f32.mrb[14].mxu0  ;;  %v421_v10 = vadd.f32 %v1096_v21, %v420_v39 }
 0x101   : > { %v584_v61 = vsel %vm520_vm7, %v418_v48, %v552_v53  ;;  %v927_v1 = vpack.c.bf16 %v602_v60, %v602_v60  ;;  %v600_v3 = vsel %vm536_vm8, %v482_v51, %v568_v55  ;;  %v983_v5 = vpop.f32.mrb[14].mxu1  ;;  %747 = vst.msk [vmem:[%s1108_s25 + $0x28] sm:$0xf] %vm736_vm3, %v911_v59  ;;  %v555_v7 = vmul.f32 0.1, %v429_v56  ;;  %v436_v9 = vpop.f32.mrb[15].mxu0 }
 0x102   : > { %v909_v2 = vpack.c.bf16 %v584_v61, %v584_v61  ;;  %v925_v6 = vpack.c.bf16 %v600_v3, %v600_v3  ;;  %vm539_vm10 = vcmp.ge.f32.partialorder %v493_v62, 0.0  ;;  %v571_v8 = vmul.f32 0.1, %v493_v62  ;;  %v500_v14 = vpop.f32.mrb[15].mxu1 }
 0x103   : > { %763 = vst.msk [vmem:[%s1108_s25 + $0x68] sm:$0xf] %vm736_vm3, %v927_v1  ;;  %v485_v11 = vadd.f32 %v1096_v21, %v484_v44  ;;  %v442_v12 = vadd.f32 %v966_v57, %v1096_v21  ;;  %v506_v13 = vadd.f32 %v982_v58, %v1096_v21  ;;  %v587_v15 = vsel %vm523_vm9, %v429_v56, %v555_v7 }
 0x104   : > { %745 = vst.msk [vmem:[%s1108_s25 + $0x20] sm:$0xf] %vm736_vm3, %v909_v2  ;;  %761 = vst.msk [vmem:[%s1108_s25 + $0x60] sm:$0xf] %vm736_vm3, %v925_v6  ;;  %v603_v16 = vsel %vm539_vm10, %v493_v62, %v571_v8  ;;  %v434_v17 = vadd.f32 %v1096_v21, %v433_v63  ;;  %v498_v18 = vadd.f32 %v1096_v21, %v497_v0  ;;  %vm521_vm11 = vcmp.ge.f32.partialorder %v421_v10, 0.0 }
 0x105   : > { %v912_v19 = vpack.c.bf16 %v587_v15, %v587_v15  ;;  %v928_v20 = vpack.c.bf16 %v603_v16, %v603_v16  ;;  %v553_v22 = vmul.f32 0.1, %v421_v10  ;;  %vm537_vm12 = vcmp.ge.f32.partialorder %v485_v11, 0.0 }
 0x106   : > { %v569_v23 = vmul.f32 0.1, %v485_v11  ;;  %vm526_vm13 = vcmp.ge.f32.partialorder %v442_v12, 0.0  ;;  %v558_v24 = vmul.f32 0.1, %v442_v12  ;;  %vm542_vm14 = vcmp.ge.f32.partialorder %v506_v13, 0.0 }
 0x107   : > { %748 = vst.msk [vmem:[%s1108_s25 + $0x2c] sm:$0xf] %vm736_vm3, %v912_v19  ;;  %764 = vst.msk [vmem:[%s1108_s25 + $0x6c] sm:$0xf] %vm736_vm3, %v928_v20  ;;  %v585_v25 = vsel %vm521_vm11, %v421_v10, %v553_v22  ;;  %v574_v26 = vmul.f32 0.1, %v506_v13  ;;  %v445_v37 = vadd.f32 %v967_v4, %v1096_v21  ;;  %v509_v39 = vadd.f32 %v983_v5, %v1096_v21 }
 0x108   : > { %vm524_vm15 = vcmp.ge.f32.partialorder %v434_v17, 0.0  ;;  %v910_v27 = vpack.c.bf16 %v585_v25, %v585_v25  ;;  %v601_v28 = vsel %vm537_vm12, %v485_v11, %v569_v23  ;;  %v590_v29 = vsel %vm526_vm13, %v442_v12, %v558_v24 }
 0x109   : > { %v556_v30 = vmul.f32 0.1, %v434_v17  ;;  %v926_v31 = vpack.c.bf16 %v601_v28, %v601_v28  ;;  %v915_v32 = vpack.c.bf16 %v590_v29, %v590_v29  ;;  %v606_v33 = vsel %vm542_vm14, %v506_v13, %v574_v26 }
 0x10a   : > { %vm540_vm0 = vcmp.ge.f32.partialorder %v498_v18, 0.0  ;;  %746 = vst.msk [vmem:[%s1108_s25 + $0x24] sm:$0xf] %vm736_vm3, %v910_v27  ;;  %v931_v34 = vpack.c.bf16 %v606_v33, %v606_v33  ;;  %v572_v36 = vmul.f32 0.1, %v498_v18  ;;  %v437_v40 = vadd.f32 %v1096_v21, %v436_v9 }
 0x10b   : > { %v588_v35 = vsel %vm524_vm15, %v434_v17, %v556_v30  ;;  %762 = vst.msk [vmem:[%s1108_s25 + $0x64] sm:$0xf] %vm736_vm3, %v926_v31  ;;  %751 = vst.msk [vmem:[%s1108_s25 + $0x38] sm:$0xf] %vm736_vm3, %v915_v32  ;;  %v501_v41 = vadd.f32 %v1096_v21, %v500_v14  ;;  %vm527_vm1 = vcmp.ge.f32.partialorder %v445_v37, 0.0  ;;  %vm543_vm2 = vcmp.ge.f32.partialorder %v509_v39, 0.0 }
 0x10c   : > { %v913_v38 = vpack.c.bf16 %v588_v35, %v588_v35  ;;  %767 = vst.msk [vmem:[%s1108_s25 + $0x78] sm:$0xf] %vm736_vm3, %v931_v34  ;;  %v604_v42 = vsel %vm540_vm0, %v498_v18, %v572_v36  ;;  %v559_v43 = vmul.f32 0.1, %v445_v37  ;;  %v575_v45 = vmul.f32 0.1, %v509_v39 }
 0x10d   : > { %v929_v44 = vpack.c.bf16 %v604_v42, %v604_v42  ;;  %vm525_vm4 = vcmp.ge.f32.partialorder %v437_v40, 0.0  ;;  %v557_v47 = vmul.f32 0.1, %v437_v40  ;;  %vm541_vm5 = vcmp.ge.f32.partialorder %v501_v41, 0.0 }
 0x10e   : > { %749 = vst.msk [vmem:[%s1108_s25 + $0x30] sm:$0xf] %vm736_vm3, %v913_v38  ;;  %v591_v46 = vsel %vm527_vm1, %v445_v37, %v559_v43  ;;  %v573_v48 = vmul.f32 0.1, %v501_v41  ;;  %v607_v49 = vsel %vm543_vm2, %v509_v39, %v575_v45 }
 0x10f   : > { %765 = vst.msk [vmem:[%s1108_s25 + $0x70] sm:$0xf] %vm736_vm3, %v929_v44  ;;  %v916_v21 = vpack.c.bf16 %v591_v46, %v591_v46  ;;  %v932_v50 = vpack.c.bf16 %v607_v49, %v607_v49  ;;  %v589_v51 = vsel %vm525_vm4, %v437_v40, %v557_v47 }
 0x110   : > { %v605_v52 = vsel %vm541_vm5, %v501_v41, %v573_v48  ;;  %v914_v53 = vpack.c.bf16 %v589_v51, %v589_v51 }
 0x111   : > { %752 = vst.msk [vmem:[%s1108_s25 + $0x3c] sm:$0xf] %vm736_vm3, %v916_v21  ;;  %v930_v54 = vpack.c.bf16 %v605_v52, %v605_v52  ;;  %768 = vst.msk [vmem:[%s1108_s25 + $0x7c] sm:$0xf] %vm736_vm3, %v932_v50 }
 0x112   : > { %750 = vst.msk [vmem:[%s1108_s25 + $0x34] sm:$0xf] %vm736_vm3, %v914_v53 }
 0x113   : > { %766 = vst.msk [vmem:[%s1108_s25 + $0x74] sm:$0xf] %vm736_vm3, %v930_v54 }
 0x114 PF: > { %s13_s12 = sadd.s32 1, %s1017_s12  }
 0x115   : > { %p10_p4 = scmp.ge.s32.totalorder %s13_s12, 10  }
 0x117   :  { %12 = sbr.rel (!%p10_p4) target bundleno = 1 (0x1), region = 62 }

</bundles_post_ra>
